<compile_context>
chip_gen: v6e
topology: v6e:2x2x1
jax: 0.10.0
libtpu: 0.0.40
codegen_flags: <defaults>
</compile_context>

<pallas_src>
import jax
import jax.numpy as jnp
from jax.experimental import pallas as pl
from jax.experimental.pallas import tpu as pltpu


EMBED_SIZE = 100
LABEL_SIZE = 2
E_PAD = 128   # embed_size padded to lane width
L_PAD = 128   # label_size padded to lane width
SUB = 8       # sublane alignment


def _round_up(x, m):
    return -(-x // m) * m


# ----------------------------------------------------------------------------
# Pallas kernel: level-wavefront tree recursion + final projection matmul
# ----------------------------------------------------------------------------
def _make_tree_rnn_kernel(levels):
    """levels: list of static (slab_base, flat_off, cnt, cnt_pad) per internal level."""

    def kernel(left_ref, right_ref,                       # SMEM scalar prefetch
               emb_ref, wl_ref, bl_ref, wp_ref, bp_ref,   # VMEM inputs
               out_ref,                                   # VMEM output
               h_buf, gather_buf):                        # VMEM scratch
        # Leaves already sit in their level-0 slab rows of emb_ref; internal and
        # padding rows are zero and are overwritten by the wavefront recursion
        # (children always live in strictly lower slabs).
        h_buf[...] = emb_ref[...]
        # gather_buf intentionally NOT zero-initialized: rows >= cnt are junk
        # that only ever reaches padded slab rows nothing reads.
        bl2 = bl_ref[...] * 2.0   # fcl(l)+fcl(r) == (l+r) @ W.T + 2b   (1 vreg)

        for (base, off, cnt, cnt_pad) in levels:
            # Gather + pre-sum children on the VPU.  Destination rows and SMEM
            # offsets are static; only the two child-row loads are dynamic.
            # gather_buf != h_buf, so the per-node chains are independent and
            # the scheduler overlaps the dynamic-sublane vld latencies.
            for j in range(cnt):
                li = left_ref[off + j]
                ri = right_ref[off + j]
                gather_buf[pl.ds(j, 1), :] = (h_buf[pl.ds(li, 1), :]
                                              + h_buf[pl.ds(ri, 1), :])

            # One MXU matmul per wavefront, sized to this level; weight read
            # straight from VMEM (not pinned in vregs across the kernel).
            x = gather_buf[pl.ds(0, cnt_pad), :]
            y = jnp.maximum(
                jnp.dot(x, wl_ref[...], preferred_element_type=jnp.float32)
                + bl2,
                0.0)

            # Contiguous, 8-aligned bulk store into this level's slab: replaces
            # the per-node dynamic scatter loop of the previous version.
            h_buf[pl.ds(base, cnt_pad), :] = y

        # Projection for all nodes (leaves + internal) in one MXU matmul.
        out_ref[...] = (jnp.dot(h_buf[...], wp_ref[...],
                                preferred_element_type=jnp.float32)
                        + bp_ref[...])

    return kernel


def tree_rnn_forward(left_idx, right_idx, leaf_embed,
                     wl_t_pad, bl_pad, wp_t_pad, bp_pad,
                     levels, k_max_pad):
    """All array inputs already padded.  Returns (n_slab, L_PAD) float32."""
    n_slab, e_pad = leaf_embed.shape
    l_pad = wp_t_pad.shape[1]

    grid_spec = pltpu.PrefetchScalarGridSpec(
        num_scalar_prefetch=2,
        grid=(1,),
        in_specs=[
            pl.BlockSpec((n_slab, e_pad), lambda i, *_: (0, 0)),   # leaf embeddings
            pl.BlockSpec((e_pad, e_pad), lambda i, *_: (0, 0)),    # fcl weight^T
            pl.BlockSpec((1, e_pad),     lambda i, *_: (0, 0)),    # fcl bias
            pl.BlockSpec((e_pad, l_pad), lambda i, *_: (0, 0)),    # proj weight^T
            pl.BlockSpec((1, l_pad),     lambda i, *_: (0, 0)),    # proj bias
        ],
        out_specs=pl.BlockSpec((n_slab, l_pad), lambda i, *_: (0, 0)),
        scratch_shapes=[pltpu.VMEM((n_slab, e_pad), jnp.float32),      # hidden slabs
                        pltpu.VMEM((k_max_pad, e_pad), jnp.float32)],  # wavefront buf
    )
    return pl.pallas_call(
        _make_tree_rnn_kernel(levels),
        out_shape=jax.ShapeDtypeStruct((n_slab, l_pad), jnp.float32),
        grid_spec=grid_spec,
        compiler_params=pltpu.CompilerParams(
            dimension_semantics=("arbitrary",)),
    )(left_idx, right_idx, leaf_embed, wl_t_pad, bl_pad, wp_t_pad, bp_pad)


# ----------------------------------------------------------------------------
# Python-side glue: tree definition, post-order flattening + level schedule
# ----------------------------------------------------------------------------
class Node:
    def __init__(self, word_id=None, left=None, right=None):
        self.word_id = word_id
        self.left = left
        self.right = right
        self.isLeaf = left is None and right is None


def flatten_postorder(root):
    """Return (left_idx, right_idx, is_leaf, word_id, depth) lists in post-order."""
    left_idx, right_idx, is_leaf, word_id, depth = [], [], [], [], []

    def walk(node):
        if node.isLeaf:
            idx = len(is_leaf)
            left_idx.append(0)
            right_idx.append(0)
            is_leaf.append(1)
            word_id.append(node.word_id)
            depth.append(0)
            return idx
        li = walk(node.left)
        ri = walk(node.right)
        idx = len(is_leaf)
        left_idx.append(li)
        right_idx.append(ri)
        is_leaf.append(0)
        word_id.append(0)
        depth.append(1 + max(depth[li], depth[ri]))
        return idx

    walk(root)
    return left_idx, right_idx, is_leaf, word_id, depth


def build_schedule(root):
    """Level-contiguous renumbering: each depth level owns an 8-aligned slab."""
    l_list, r_list, f_list, w_list, d_list = flatten_postorder(root)
    n = len(f_list)
    max_depth = max(d_list)

    by_depth = [[] for _ in range(max_depth + 1)]
    for i in range(n):
        by_depth[d_list[i]].append(i)

    new_row = [0] * n
    levels = []                       # (slab_base, flat_off, cnt, cnt_pad), d >= 1
    left_flat, right_flat = [], []
    leaf_rows, leaf_words = [], []
    base = 0
    for d in range(max_depth + 1):
        nodes = by_depth[d]
        cnt = len(nodes)
        cnt_pad = _round_up(max(cnt, 1), SUB)
        for j, i in enumerate(nodes):
            new_row[i] = base + j
        if d == 0:
            leaf_rows = [new_row[i] for i in nodes]
            leaf_words = [w_list[i] for i in nodes]
        else:
            off = len(left_flat)
            for i in nodes:
                left_flat.append(new_row[l_list[i]])
                right_flat.append(new_row[r_list[i]])
            levels.append((base, off, cnt, cnt_pad))
        base += cnt_pad

    n_slab = base
    k_max_pad = max([lv[3] for lv in levels], default=SUB)
    if not left_flat:                 # degenerate single-leaf tree
        left_flat, right_flat = [0], [0]

    return dict(n=n, n_slab=n_slab, k_max_pad=k_max_pad, levels=levels,
                new_row=new_row, left_flat=left_flat, right_flat=right_flat,
                leaf_rows=leaf_rows, leaf_words=leaf_words)


def rnn_model_forward(root, embedding, wl, bl, wp, bp):
    """Wrapper reproducing RNN_Model.forward: returns (num_nodes, 1, label_size)."""
    sch = build_schedule(root)
    n, n_slab = sch["n"], sch["n_slab"]

    left_a = jnp.asarray(sch["left_flat"], dtype=jnp.int32)
    right_a = jnp.asarray(sch["right_flat"], dtype=jnp.int32)

    # Leaf-embedding slab in the renumbered (level-contiguous) node space.
    emb_pad = jnp.pad(embedding, ((0, 0), (0, E_PAD - EMBED_SIZE)))
    leaf_embed = jnp.zeros((n_slab, E_PAD), jnp.float32).at[
        jnp.asarray(sch["leaf_rows"], dtype=jnp.int32)
    ].set(emb_pad[jnp.asarray(sch["leaf_words"], dtype=jnp.int32)])

    # PyTorch Linear: y = x @ W.T + b  -> pass W.T, zero-padded.
    wl_t_pad = jnp.pad(wl.T, ((0, E_PAD - EMBED_SIZE), (0, E_PAD - EMBED_SIZE)))
    bl_pad = jnp.pad(bl, (0, E_PAD - EMBED_SIZE))[None, :]
    wp_t_pad = jnp.pad(wp.T, ((0, E_PAD - EMBED_SIZE), (0, L_PAD - LABEL_SIZE)))
    bp_pad = jnp.pad(bp, (0, L_PAD - LABEL_SIZE))[None, :]

    out_slab = tree_rnn_forward(left_a, right_a, leaf_embed,
                                wl_t_pad, bl_pad, wp_t_pad, bp_pad,
                                sch["levels"], sch["k_max_pad"])

    # Restore post-order node ordering (cheap XLA take) and drop padding; match
    # torch.cat of (1, 1, label_size) tensors.
    perm = jnp.asarray(sch["new_row"], dtype=jnp.int32)
    return out_slab[perm, :LABEL_SIZE].reshape(n, 1, LABEL_SIZE)


def reference_forward(root, embedding, wl, bl, wp, bp):
    """Pure-JAX recursive reference mirroring walk_tree exactly."""
    outs = []

    def walk(node):
        if node.isLeaf:
            h = embedding[node.word_id][None, :]
        else:
            l = walk(node.left)
            r = walk(node.right)
            h = jax.nn.relu(l @ wl.T + bl + r @ wl.T + bl)
        outs.append((h @ wp.T + bp)[None])
        return h

    walk(root)
    return jnp.concatenate(outs, axis=0)


if __name__ == "__main__":
    vocab_size = 50

    # Deterministic parameter init (synthetic, not a checkpoint).
    key = jax.random.PRNGKey(0)
    k_emb, k_wl, k_bl, k_wp, k_bp = jax.random.split(key, 5)
    embedding = jax.random.normal(k_emb, (vocab_size, EMBED_SIZE), jnp.float32)
    wl = jax.random.normal(k_wl, (EMBED_SIZE, EMBED_SIZE), jnp.float32) * 0.1
    bl = jax.random.normal(k_bl, (EMBED_SIZE,), jnp.float32) * 0.1
    wp = jax.random.normal(k_wp, (LABEL_SIZE, EMBED_SIZE), jnp.float32) * 0.1
    bp = jax.random.normal(k_bp, (LABEL_SIZE,), jnp.float32) * 0.1

    # Small example parse tree: ((w3 w7) ((w1 w12) (w5 (w9 w2)))) -> 13 nodes.
    tree1 = Node(
        left=Node(left=Node(word_id=3), right=Node(word_id=7)),
        right=Node(
            left=Node(left=Node(word_id=1), right=Node(word_id=12)),
            right=Node(left=Node(word_id=5),
                       right=Node(left=Node(word_id=9), right=Node(word_id=2))),
        ),
    )

    # Deeper / bushier regression tree (balanced depth-4 subtree + unbalanced
    # right side) to exercise multi-node wavefronts and error compounding.
    _counter = [0]

    def _full(depth):
        if depth == 0:
            _counter[0] += 1
            return Node(word_id=_counter[0] % vocab_size)
        return Node(left=_full(depth - 1), right=_full(depth - 1))

    tree2 = Node(left=_full(4),
                 right=Node(left=Node(word_id=11),
                            right=Node(left=Node(word_id=23),
                                       right=Node(word_id=42))))

    for tag, tree, rtol in (("tree1", tree1, 1e-4), ("tree2", tree2, 1e-3)):
        out = jax.block_until_ready(
            rnn_model_forward(tree, embedding, wl, bl, wp, bp))
        ref = reference_forward(tree, embedding, wl, bl, wp, bp)
        assert out.shape == ref.shape, (tag, out.shape, ref.shape)
        max_err = float(jnp.max(jnp.abs(out - ref)))
        assert jnp.allclose(out, ref, atol=1e-4, rtol=rtol), (tag, max_err)

    print("KERNEL_OK")
</pallas_src>

<mosaic_0001>
module attributes {stable_mosaic.version = 11 : i64} {
  func.func @kernel(%arg0: i32, %arg1: memref<6xi32, #tpu.memory_space<smem>>, %arg2: memref<6xi32, #tpu.memory_space<smem>>, %arg3: memref<40x128xf32, #tpu.memory_space<vmem>>, %arg4: memref<128x128xf32, #tpu.memory_space<vmem>>, %arg5: memref<1x128xf32, #tpu.memory_space<vmem>>, %arg6: memref<128x128xf32, #tpu.memory_space<vmem>>, %arg7: memref<1x128xf32, #tpu.memory_space<vmem>>, %arg8: memref<40x128xf32, #tpu.memory_space<vmem>>, %arg9: memref<40x128xf32, #tpu.memory_space<vmem>>, %arg10: memref<8x128xf32, #tpu.memory_space<vmem>>) attributes {dimension_semantics = [#tpu.dimension_semantics<arbitrary>], iteration_bounds = array<i64: 1>, scalar_prefetch = 2 : i64, scratch_operands = 2 : i64, tpu.core_type = #tpu.core_type<tc>, window_params = [{pipeline_mode = #tpu.pipeline_mode<synchronous>, transform_indices = @transform_0, window_bounds = array<i64: 40, 128>}, {pipeline_mode = #tpu.pipeline_mode<synchronous>, transform_indices = @transform_1, window_bounds = array<i64: 128, 128>}, {pipeline_mode = #tpu.pipeline_mode<synchronous>, transform_indices = @transform_2, window_bounds = array<i64: 1, 128>}, {pipeline_mode = #tpu.pipeline_mode<synchronous>, transform_indices = @transform_3, window_bounds = array<i64: 128, 128>}, {pipeline_mode = #tpu.pipeline_mode<synchronous>, transform_indices = @transform_4, window_bounds = array<i64: 1, 128>}, {pipeline_mode = #tpu.pipeline_mode<synchronous>, transform_indices = @transform_5, window_bounds = array<i64: 40, 128>}]} {
    %c0 = arith.constant 0 : index
    %c0_0 = arith.constant 0 : index
    %0 = vector.load %arg3[%c0, %c0_0] : memref<40x128xf32, #tpu.memory_space<vmem>>, vector<40x128xf32>
    %c0_1 = arith.constant 0 : index
    %c0_2 = arith.constant 0 : index
    %1 = vector.load %arg9[%c0_1, %c0_2] : memref<40x128xf32, #tpu.memory_space<vmem>>, vector<40x128xf32>
    tpu.vector_store %arg9[%c0_1, %c0_2], %0 {strides = array<i32>} : memref<40x128xf32, #tpu.memory_space<vmem>>, vector<40x128xf32>,
    %c0_3 = arith.constant 0 : index
    %c0_4 = arith.constant 0 : index
    %2 = vector.load %arg5[%c0_3, %c0_4] : memref<1x128xf32, #tpu.memory_space<vmem>>, vector<1x128xf32>
    %cst = arith.constant 2.000000e+00 : f32
    %3 = vector.broadcast %cst : f32 to vector<1x128xf32>
    %4 = arith.mulf %2, %3 : vector<1x128xf32>
    %c0_5 = arith.constant 0 : index
    %5 = memref.load %arg1[%c0_5] : memref<6xi32, #tpu.memory_space<smem>>
    %c0_6 = arith.constant 0 : index
    %6 = memref.load %arg2[%c0_6] : memref<6xi32, #tpu.memory_space<smem>>
    %7 = arith.index_cast %5 : i32 to index
    %c0_7 = arith.constant 0 : index
    %8 = vector.load %arg9[%7, %c0_7] : memref<40x128xf32, #tpu.memory_space<vmem>>, vector<1x128xf32>
    %9 = arith.index_cast %6 : i32 to index
    %c0_8 = arith.constant 0 : index
    %10 = vector.load %arg9[%9, %c0_8] : memref<40x128xf32, #tpu.memory_space<vmem>>, vector<1x128xf32>
    %11 = arith.addf %8, %10 : vector<1x128xf32>
    %c0_9 = arith.constant 0 : index
    %c0_10 = arith.constant 0 : index
    %12 = vector.load %arg10[%c0_9, %c0_10] : memref<8x128xf32, #tpu.memory_space<vmem>>, vector<1x128xf32>
    tpu.vector_store %arg10[%c0_9, %c0_10], %11 {strides = array<i32>} : memref<8x128xf32, #tpu.memory_space<vmem>>, vector<1x128xf32>,
    %c1 = arith.constant 1 : index
    %13 = memref.load %arg1[%c1] : memref<6xi32, #tpu.memory_space<smem>>
    %c1_11 = arith.constant 1 : index
    %14 = memref.load %arg2[%c1_11] : memref<6xi32, #tpu.memory_space<smem>>
    %15 = arith.index_cast %13 : i32 to index
    %c0_12 = arith.constant 0 : index
    %16 = vector.load %arg9[%15, %c0_12] : memref<40x128xf32, #tpu.memory_space<vmem>>, vector<1x128xf32>
    %17 = arith.index_cast %14 : i32 to index
    %c0_13 = arith.constant 0 : index
    %18 = vector.load %arg9[%17, %c0_13] : memref<40x128xf32, #tpu.memory_space<vmem>>, vector<1x128xf32>
    %19 = arith.addf %16, %18 : vector<1x128xf32>
    %c1_14 = arith.constant 1 : index
    %c0_15 = arith.constant 0 : index
    %20 = vector.load %arg10[%c1_14, %c0_15] : memref<8x128xf32, #tpu.memory_space<vmem>>, vector<1x128xf32>
    tpu.vector_store %arg10[%c1_14, %c0_15], %19 {strides = array<i32>} : memref<8x128xf32, #tpu.memory_space<vmem>>, vector<1x128xf32>,
    %c2 = arith.constant 2 : index
    %21 = memref.load %arg1[%c2] : memref<6xi32, #tpu.memory_space<smem>>
    %c2_16 = arith.constant 2 : index
    %22 = memref.load %arg2[%c2_16] : memref<6xi32, #tpu.memory_space<smem>>
    %23 = arith.index_cast %21 : i32 to index
    %c0_17 = arith.constant 0 : index
    %24 = vector.load %arg9[%23, %c0_17] : memref<40x128xf32, #tpu.memory_space<vmem>>, vector<1x128xf32>
    %25 = arith.index_cast %22 : i32 to index
    %c0_18 = arith.constant 0 : index
    %26 = vector.load %arg9[%25, %c0_18] : memref<40x128xf32, #tpu.memory_space<vmem>>, vector<1x128xf32>
    %27 = arith.addf %24, %26 : vector<1x128xf32>
    %c2_19 = arith.constant 2 : index
    %c0_20 = arith.constant 0 : index
    %28 = vector.load %arg10[%c2_19, %c0_20] : memref<8x128xf32, #tpu.memory_space<vmem>>, vector<1x128xf32>
    tpu.vector_store %arg10[%c2_19, %c0_20], %27 {strides = array<i32>} : memref<8x128xf32, #tpu.memory_space<vmem>>, vector<1x128xf32>,
    %c0_21 = arith.constant 0 : index
    %c0_22 = arith.constant 0 : index
    %29 = vector.load %arg10[%c0_21, %c0_22] : memref<8x128xf32, #tpu.memory_space<vmem>>, vector<8x128xf32>
    %c0_23 = arith.constant 0 : index
    %c0_24 = arith.constant 0 : index
    %30 = vector.load %arg4[%c0_23, %c0_24] : memref<128x128xf32, #tpu.memory_space<vmem>>, vector<128x128xf32>
    %cst_25 = arith.constant dense<0.000000e+00> : vector<8x128xf32>
    %31 = tpu.matmul %29, %30, %cst_25 {dimension_numbers = #tpu.dot_dimension_numbers<[1], [0], [0], [1], [0, 0, 1, 1], [], []>} : vector<8x128xf32>, vector<128x128xf32>, vector<8x128xf32> -> vector<8x128xf32>
    %32 = vector.broadcast %4 : vector<1x128xf32> to vector<8x128xf32>
    %33 = arith.addf %31, %32 : vector<8x128xf32>
    %cst_26 = arith.constant 0.000000e+00 : f32
    %34 = vector.broadcast %cst_26 : f32 to vector<8x128xf32>
    %35 = arith.maximumf %33, %34 : vector<8x128xf32>
    %c8 = arith.constant 8 : index
    %c0_27 = arith.constant 0 : index
    %36 = vector.load %arg9[%c8, %c0_27] : memref<40x128xf32, #tpu.memory_space<vmem>>, vector<8x128xf32>
    tpu.vector_store %arg9[%c8, %c0_27], %35 {strides = array<i32>} : memref<40x128xf32, #tpu.memory_space<vmem>>, vector<8x128xf32>,
    %c3 = arith.constant 3 : index
    %37 = memref.load %arg1[%c3] : memref<6xi32, #tpu.memory_space<smem>>
    %c3_28 = arith.constant 3 : index
    %38 = memref.load %arg2[%c3_28] : memref<6xi32, #tpu.memory_space<smem>>
    %39 = arith.index_cast %37 : i32 to index
    %c0_29 = arith.constant 0 : index
    %40 = vector.load %arg9[%39, %c0_29] : memref<40x128xf32, #tpu.memory_space<vmem>>, vector<1x128xf32>
    %41 = arith.index_cast %38 : i32 to index
    %c0_30 = arith.constant 0 : index
    %42 = vector.load %arg9[%41, %c0_30] : memref<40x128xf32, #tpu.memory_space<vmem>>, vector<1x128xf32>
    %43 = arith.addf %40, %42 : vector<1x128xf32>
    %c0_31 = arith.constant 0 : index
    %c0_32 = arith.constant 0 : index
    %44 = vector.load %arg10[%c0_31, %c0_32] : memref<8x128xf32, #tpu.memory_space<vmem>>, vector<1x128xf32>
    tpu.vector_store %arg10[%c0_31, %c0_32], %43 {strides = array<i32>} : memref<8x128xf32, #tpu.memory_space<vmem>>, vector<1x128xf32>,
    %c0_33 = arith.constant 0 : index
    %c0_34 = arith.constant 0 : index
    %45 = vector.load %arg10[%c0_33, %c0_34] : memref<8x128xf32, #tpu.memory_space<vmem>>, vector<8x128xf32>
    %c0_35 = arith.constant 0 : index
    %c0_36 = arith.constant 0 : index
    %46 = vector.load %arg4[%c0_35, %c0_36] : memref<128x128xf32, #tpu.memory_space<vmem>>, vector<128x128xf32>
    %cst_37 = arith.constant dense<0.000000e+00> : vector<8x128xf32>
    %47 = tpu.matmul %45, %46, %cst_37 {dimension_numbers = #tpu.dot_dimension_numbers<[1], [0], [0], [1], [0, 0, 1, 1], [], []>} : vector<8x128xf32>, vector<128x128xf32>, vector<8x128xf32> -> vector<8x128xf32>
    %48 = vector.broadcast %4 : vector<1x128xf32> to vector<8x128xf32>
    %49 = arith.addf %47, %48 : vector<8x128xf32>
    %cst_38 = arith.constant 0.000000e+00 : f32
    %50 = vector.broadcast %cst_38 : f32 to vector<8x128xf32>
    %51 = arith.maximumf %49, %50 : vector<8x128xf32>
    %c16 = arith.constant 16 : index
    %c0_39 = arith.constant 0 : index
    %52 = vector.load %arg9[%c16, %c0_39] : memref<40x128xf32, #tpu.memory_space<vmem>>, vector<8x128xf32>
    tpu.vector_store %arg9[%c16, %c0_39], %51 {strides = array<i32>} : memref<40x128xf32, #tpu.memory_space<vmem>>, vector<8x128xf32>,
    %c4 = arith.constant 4 : index
    %53 = memref.load %arg1[%c4] : memref<6xi32, #tpu.memory_space<smem>>
    %c4_40 = arith.constant 4 : index
    %54 = memref.load %arg2[%c4_40] : memref<6xi32, #tpu.memory_space<smem>>
    %55 = arith.index_cast %53 : i32 to index
    %c0_41 = arith.constant 0 : index
    %56 = vector.load %arg9[%55, %c0_41] : memref<40x128xf32, #tpu.memory_space<vmem>>, vector<1x128xf32>
    %57 = arith.index_cast %54 : i32 to index
    %c0_42 = arith.constant 0 : index
    %58 = vector.load %arg9[%57, %c0_42] : memref<40x128xf32, #tpu.memory_space<vmem>>, vector<1x128xf32>
    %59 = arith.addf %56, %58 : vector<1x128xf32>
    %c0_43 = arith.constant 0 : index
    %c0_44 = arith.constant 0 : index
    %60 = vector.load %arg10[%c0_43, %c0_44] : memref<8x128xf32, #tpu.memory_space<vmem>>, vector<1x128xf32>
    tpu.vector_store %arg10[%c0_43, %c0_44], %59 {strides = array<i32>} : memref<8x128xf32, #tpu.memory_space<vmem>>, vector<1x128xf32>,
    %c0_45 = arith.constant 0 : index
    %c0_46 = arith.constant 0 : index
    %61 = vector.load %arg10[%c0_45, %c0_46] : memref<8x128xf32, #tpu.memory_space<vmem>>, vector<8x128xf32>
    %c0_47 = arith.constant 0 : index
    %c0_48 = arith.constant 0 : index
    %62 = vector.load %arg4[%c0_47, %c0_48] : memref<128x128xf32, #tpu.memory_space<vmem>>, vector<128x128xf32>
    %cst_49 = arith.constant dense<0.000000e+00> : vector<8x128xf32>
    %63 = tpu.matmul %61, %62, %cst_49 {dimension_numbers = #tpu.dot_dimension_numbers<[1], [0], [0], [1], [0, 0, 1, 1], [], []>} : vector<8x128xf32>, vector<128x128xf32>, vector<8x128xf32> -> vector<8x128xf32>
    %64 = vector.broadcast %4 : vector<1x128xf32> to vector<8x128xf32>
    %65 = arith.addf %63, %64 : vector<8x128xf32>
    %cst_50 = arith.constant 0.000000e+00 : f32
    %66 = vector.broadcast %cst_50 : f32 to vector<8x128xf32>
    %67 = arith.maximumf %65, %66 : vector<8x128xf32>
    %c24 = arith.constant 24 : index
    %c0_51 = arith.constant 0 : index
    %68 = vector.load %arg9[%c24, %c0_51] : memref<40x128xf32, #tpu.memory_space<vmem>>, vector<8x128xf32>
    tpu.vector_store %arg9[%c24, %c0_51], %67 {strides = array<i32>} : memref<40x128xf32, #tpu.memory_space<vmem>>, vector<8x128xf32>,
    %c5 = arith.constant 5 : index
    %69 = memref.load %arg1[%c5] : memref<6xi32, #tpu.memory_space<smem>>
    %c5_52 = arith.constant 5 : index
    %70 = memref.load %arg2[%c5_52] : memref<6xi32, #tpu.memory_space<smem>>
    %71 = arith.index_cast %69 : i32 to index
    %c0_53 = arith.constant 0 : index
    %72 = vector.load %arg9[%71, %c0_53] : memref<40x128xf32, #tpu.memory_space<vmem>>, vector<1x128xf32>
    %73 = arith.index_cast %70 : i32 to index
    %c0_54 = arith.constant 0 : index
    %74 = vector.load %arg9[%73, %c0_54] : memref<40x128xf32, #tpu.memory_space<vmem>>, vector<1x128xf32>
    %75 = arith.addf %72, %74 : vector<1x128xf32>
    %c0_55 = arith.constant 0 : index
    %c0_56 = arith.constant 0 : index
    %76 = vector.load %arg10[%c0_55, %c0_56] : memref<8x128xf32, #tpu.memory_space<vmem>>, vector<1x128xf32>
    tpu.vector_store %arg10[%c0_55, %c0_56], %75 {strides = array<i32>} : memref<8x128xf32, #tpu.memory_space<vmem>>, vector<1x128xf32>,
    %c0_57 = arith.constant 0 : index
    %c0_58 = arith.constant 0 : index
    %77 = vector.load %arg10[%c0_57, %c0_58] : memref<8x128xf32, #tpu.memory_space<vmem>>, vector<8x128xf32>
    %c0_59 = arith.constant 0 : index
    %c0_60 = arith.constant 0 : index
    %78 = vector.load %arg4[%c0_59, %c0_60] : memref<128x128xf32, #tpu.memory_space<vmem>>, vector<128x128xf32>
    %cst_61 = arith.constant dense<0.000000e+00> : vector<8x128xf32>
    %79 = tpu.matmul %77, %78, %cst_61 {dimension_numbers = #tpu.dot_dimension_numbers<[1], [0], [0], [1], [0, 0, 1, 1], [], []>} : vector<8x128xf32>, vector<128x128xf32>, vector<8x128xf32> -> vector<8x128xf32>
    %80 = vector.broadcast %4 : vector<1x128xf32> to vector<8x128xf32>
    %81 = arith.addf %79, %80 : vector<8x128xf32>
    %cst_62 = arith.constant 0.000000e+00 : f32
    %82 = vector.broadcast %cst_62 : f32 to vector<8x128xf32>
    %83 = arith.maximumf %81, %82 : vector<8x128xf32>
    %c32 = arith.constant 32 : index
    %c0_63 = arith.constant 0 : index
    %84 = vector.load %arg9[%c32, %c0_63] : memref<40x128xf32, #tpu.memory_space<vmem>>, vector<8x128xf32>
    tpu.vector_store %arg9[%c32, %c0_63], %83 {strides = array<i32>} : memref<40x128xf32, #tpu.memory_space<vmem>>, vector<8x128xf32>,
    %c0_64 = arith.constant 0 : index
    %c0_65 = arith.constant 0 : index
    %85 = vector.load %arg9[%c0_64, %c0_65] : memref<40x128xf32, #tpu.memory_space<vmem>>, vector<40x128xf32>
    %c0_66 = arith.constant 0 : index
    %c0_67 = arith.constant 0 : index
    %86 = vector.load %arg6[%c0_66, %c0_67] : memref<128x128xf32, #tpu.memory_space<vmem>>, vector<128x128xf32>
    %cst_68 = arith.constant dense<0.000000e+00> : vector<40x128xf32>
    %87 = tpu.matmul %85, %86, %cst_68 {dimension_numbers = #tpu.dot_dimension_numbers<[1], [0], [0], [1], [0, 0, 1, 1], [], []>} : vector<40x128xf32>, vector<128x128xf32>, vector<40x128xf32> -> vector<40x128xf32>
    %c0_69 = arith.constant 0 : index
    %c0_70 = arith.constant 0 : index
    %88 = vector.load %arg7[%c0_69, %c0_70] : memref<1x128xf32, #tpu.memory_space<vmem>>, vector<1x128xf32>
    %89 = vector.broadcast %88 : vector<1x128xf32> to vector<40x128xf32>
    %90 = arith.addf %87, %89 : vector<40x128xf32>
    %c0_71 = arith.constant 0 : index
    %c0_72 = arith.constant 0 : index
    %91 = vector.load %arg8[%c0_71, %c0_72] : memref<40x128xf32, #tpu.memory_space<vmem>>, vector<40x128xf32>
    tpu.vector_store %arg8[%c0_71, %c0_72], %90 {strides = array<i32>} : memref<40x128xf32, #tpu.memory_space<vmem>>, vector<40x128xf32>,
    return
  }
  func.func @transform_0(%arg0: i32, %arg1: memref<6xi32, #tpu.memory_space<smem>>, %arg2: memref<6xi32, #tpu.memory_space<smem>>) -> (i32, i32) {
    %c0_i32 = arith.constant 0 : i32
    %c0_i32_0 = arith.constant 0 : i32
    %c0_i32_1 = arith.constant 0 : i32
    return %c0_i32, %c0_i32_0 : i32, i32
  }
  func.func @transform_1(%arg0: i32, %arg1: memref<6xi32, #tpu.memory_space<smem>>, %arg2: memref<6xi32, #tpu.memory_space<smem>>) -> (i32, i32) {
    %c0_i32 = arith.constant 0 : i32
    %c0_i32_0 = arith.constant 0 : i32
    %c0_i32_1 = arith.constant 0 : i32
    return %c0_i32, %c0_i32_0 : i32, i32
  }
  func.func @transform_2(%arg0: i32, %arg1: memref<6xi32, #tpu.memory_space<smem>>, %arg2: memref<6xi32, #tpu.memory_space<smem>>) -> (i32, i32) {
    %c0_i32 = arith.constant 0 : i32
    %c0_i32_0 = arith.constant 0 : i32
    %c0_i32_1 = arith.constant 0 : i32
    return %c0_i32, %c0_i32_0 : i32, i32
  }
  func.func @transform_3(%arg0: i32, %arg1: memref<6xi32, #tpu.memory_space<smem>>, %arg2: memref<6xi32, #tpu.memory_space<smem>>) -> (i32, i32) {
    %c0_i32 = arith.constant 0 : i32
    %c0_i32_0 = arith.constant 0 : i32
    %c0_i32_1 = arith.constant 0 : i32
    return %c0_i32, %c0_i32_0 : i32, i32
  }
  func.func @transform_4(%arg0: i32, %arg1: memref<6xi32, #tpu.memory_space<smem>>, %arg2: memref<6xi32, #tpu.memory_space<smem>>) -> (i32, i32) {
    %c0_i32 = arith.constant 0 : i32
    %c0_i32_0 = arith.constant 0 : i32
    %c0_i32_1 = arith.constant 0 : i32
    return %c0_i32, %c0_i32_0 : i32, i32
  }
  func.func @transform_5(%arg0: i32, %arg1: memref<6xi32, #tpu.memory_space<smem>>, %arg2: memref<6xi32, #tpu.memory_space<smem>>) -> (i32, i32) {
    %c0_i32 = arith.constant 0 : i32
    %c0_i32_0 = arith.constant 0 : i32
    %c0_i32_1 = arith.constant 0 : i32
    return %c0_i32, %c0_i32_0 : i32, i32
  }
}

</mosaic_0001>

<bundles_post_ra>
// kernel: tpu_custom_call.1
= control target key start
LH: loop header
LB: loop body
LE: loop exit
PB: predicated region body
PF: predicated region fallthrough
CT: control target
= control target key end

     0   :  { %s1052_s24 = smov [#allocation5]   ;;  %s1370_s0 = inlined_call_operand.hbm [shape: s32[6], index: 0, kind: input, shape index: {}]   ;;  %s1371_s2 = inlined_call_operand.hbm [shape: f32[40,128], index: 2, kind: input, shape index: {}]   ;;  %s1372_s3 = inlined_call_operand.hbm [shape: f32[128,128], index: 3, kind: input, shape index: {}]   ;;  %s1373_s4 = inlined_call_operand.vmem [shape: f32[1,128], index: 4, kind: input, shape index: {}]   ;;  %s1374_s5 = inlined_call_operand.hbm [shape: f32[128,128], index: 5, kind: input, shape index: {}]   ;;  %s1375_s6 = inlined_call_operand.vmem [shape: f32[1,128], index: 6, kind: input, shape index: {}]   ;;  %s1376_s7 = inlined_call_operand.hbm [shape: f32[40,128], index: 7, kind: output, shape index: {}]   ;;  %s1377_s1 = inlined_call_operand.vmem [shape: s32[6], index: 1, kind: input, shape index: {}]  }
   0x1   :  { %13 = dma.hbm_to_smem %s1370_s0, 16, %s1052_s24, [#allocation4] }
   0x2   :  { %s14_s29 = sshll.u32 %s1377_s1, 4  ;;  %s15_s29 = int_to_ptr.vmem [resolvable:$true] %s14_s29 }
   0x3   :  { %s952_s30 = scalar_lea.vmem %s15_s29, 16  ;;  %p957_p1 = scmp.lt.s32.totalorder %s15_s29, %s15_s29 }
   0x4   :  { %p953_p0 = scmp.ne.s32.totalorder %s15_s29, %s952_s30  ;;  %p958_p2 = scmp.lt.s32.totalorder %s952_s30, %s952_s30 }
   0x6   :  { %p959_p3 = por %p958_p2, %p957_p1 }
   0x8   :  { %p960_p4 = pnand %p959_p3, %p953_p0 }
   0xa   :  { %963 = shalt.err (!%p960_p4)  }
   0xb   :  { %s1053_s8 = smov [#allocation6]  }
   0xc   :  { %17 = dma.vmem_to_smem %s15_s29, 16, %s1053_s8, [#allocation4] }
   0xd   :  { %1044 = dma.done.wait [#allocation4], 32 }
   0xe   :  { %1045 = vsyncadd [#allocation4], 4294967264 }
   0xf   :  { %19 = sfence }
  0x10   :  { %20 = vsyncpa [#allocation8], 0 }
  0x11   :  { %21 = vsyncpa [#allocation11], 0 }
  0x12   :  { %22 = vsyncpa [#allocation9], 0  ;;  %s1054_s0 = smov [#allocation10]   ;;  %s1055_s10 = smov [#allocation7]  }
  0x13   :  { %s40_s9 = sshll.u32 %s1054_s0, 4  ;;  %s28_s1 = sshll.u32 %s1055_s10, 4  ;;  %s41_s9 = int_to_ptr.vmem [resolvable:$true] %s40_s9  ;;  %s29_s1 = int_to_ptr.vmem [resolvable:$true] %s28_s1 }
  0x14   :  { %s972_s11 = scalar_lea.vmem %s41_s9, 2048  ;;  %p977_p6 = scmp.lt.s32.totalorder %s41_s9, %s41_s9 }
  0x15   :  { %p973_p5 = scmp.ne.s32.totalorder %s41_s9, %s972_s11  ;;  %p978_p7 = scmp.lt.s32.totalorder %s972_s11, %s972_s11 }
  0x17   :  { %p979_p8 = por %p978_p7, %p977_p6 }
  0x19   :  { %p980_p9 = pnand %p979_p8, %p973_p5 }
  0x1b   :  { %983 = shalt.err (!%p980_p9)
}
  0x1c   :  { %s1056_s12 = smov 128   ;;  %s1057_s13 = smov 8  }
  0x1d   :  { %46 = dma.hbm_to_vmem [thread:$0]  %s1372_s3, 2048, %s41_s9, [#allocation11], %s1056_s12, %s1056_s12, %s1057_s13  }
  0x1e   :  { %s992_s16 = scalar_lea.vmem %s29_s1, 640  ;;  %p997_p11 = scmp.lt.s32.totalorder %s29_s1, %s29_s1 }
  0x1f   :  { %p993_p10 = scmp.ne.s32.totalorder %s29_s1, %s992_s16  ;;  %p998_p12 = scmp.lt.s32.totalorder %s992_s16, %s992_s16 }
  0x21   :  { %p999_p13 = por %p998_p12, %p997_p11 }
  0x23   :  { %p1000_p0 = pnand %p999_p13, %p993_p10 }
  0x25   :  { %1003 = shalt.err (!%p1000_p0)
}
  0x26   :  { %34 = dma.hbm_to_vmem [thread:$0]  %s1371_s2, 640, %s29_s1, [#allocation8], %s1056_s12, %s1056_s12, %s1057_s13  }
  0x27   :  { %s1058_s19 = smov [#allocation12]  }
  0x28   :  { %s54_s20 = sshll.u32 %s1058_s19, 4  ;;  %s55_s20 = int_to_ptr.vmem [resolvable:$true] %s54_s20 }
  0x29   :  { %s1012_s21 = scalar_lea.vmem %s55_s20, 2048  ;;  %p1017_p2 = scmp.lt.s32.totalorder %s55_s20, %s55_s20 }
  0x2a   :  { %p1013_p1 = scmp.ne.s32.totalorder %s55_s20, %s1012_s21  ;;  %p1018_p3 = scmp.lt.s32.totalorder %s1012_s21, %s1012_s21 }
  0x2c   :  { %p1019_p4 = por %p1018_p3, %p1017_p2 }
  0x2e   :  { %p1020_p5 = pnand %p1019_p4, %p1013_p1 }
  0x30   :  { %1023 = shalt.err (!%p1020_p5)
}
  0x31   :  { %60 = dma.hbm_to_vmem [thread:$0]  %s1374_s5, 2048, %s55_s20, [#allocation11], %s1056_s12, %s1056_s12, %s1057_s13  }
  0x32   :  { %1046 = dma.done.wait [#allocation8], 640  }
  0x33   :  { %1047 = vsyncadd [#allocation8], 4294966656 }
  0x34   :  { %1048 = dma.done.wait [#allocation11], 4096  }
  0x35   :  { %1049 = vsyncadd [#allocation11], 4294963200  ;;  %v1059_v0 = vmov 0.0   ;;  %vm1060_vm0 = vmmov 0   ;;  %s1132_s2 = sld [smem:[#allocation5]]  ;;  %v1134_v1 = vld [vmem:[#allocation10 + $0x78] sm:$0xff]  ;;  %v126_v32 = vlaneseq }
  0x36   :  { %747 = vmatprep.subr.mxu1 %v1059_v0  ;;  %779 = vmatprep.mubr.msk.f32.mxu1 %vm1060_vm0, %v1059_v0  ;;  %v1136_v2 = vld [vmem:[#allocation10 + $0x70] sm:$0xff]  ;;  %s1138_s5 = sld [smem:[#allocation6]]  ;;  %v1145_v3 = vld [vmem:[#allocation10 + $0x68] sm:$0xff]  ;;  %v1155_v4 = vld [vmem:[#allocation10 + $0x60] sm:$0xff] }
  0x37   :  { %817 = vmatprep.subr.mxu0 %v1059_v0  ;;  %849 = vmatprep.mubr.msk.f32.mxu0 %vm1060_vm0, %v1059_v0  ;;  %s1141_s23 = sld [smem:[#allocation5 + $0x1]]  ;;  %v1161_v5 = vld [vmem:[#allocation10 + $0x58] sm:$0xff]  ;;  %v73_v7 = vld [vmem:[#allocation7 + $0x8] sm:$0xff]  ;;  %v74_v8 = vld [vmem:[#allocation7 + $0x10] sm:$0xff]  ;;  %v127_v33 = vshrl.u32 %v126_v32, 7 }
  0x38   :  { %748 = vmatpush3.msra.mxu1 %v1134_v1  ;;  %818 = vmatpush3.msra.mxu0 %v1134_v1  ;;  %s1147_s24 = sld [smem:[#allocation6 + $0x1]]  ;;  %v1163_v6 = vld [vmem:[#allocation7] sm:$0xff]  ;;  %v75_v9 = vld [vmem:[#allocation7 + $0x18] sm:$0xff]  ;;  %78 = vst [vmem:[#allocation2 + $0x8] sm:$0xff] %v73_v7  ;;  %79 = vst [vmem:[#allocation2 + $0x10] sm:$0xff] %v74_v8 }
  0x39   :  { %749 = vmatprep.subr.mxu1 %v1059_v0  ;;  %819 = vmatprep.subr.mxu0 %v1059_v0  ;;  %s1151_s25 = sld [smem:[#allocation5 + $0x2]]  ;;  %v76_v10 = vld [vmem:[#allocation7 + $0x20] sm:$0xff]  ;;  %77 = vst [vmem:[#allocation2] sm:$0xff] %v1163_v6  ;;  %80 = vst [vmem:[#allocation2 + $0x18] sm:$0xff] %v75_v9  ;;  %v1172_v11 = vld [vmem:[#allocation10 + $0x50] sm:$0xff]  ;;  %v128_v36 = vsub.s32 0, %v127_v33 }
  0x3a   :  { %750 = vmatpush3.msra.mxu1 %v1136_v2  ;;  %820 = vmatpush3.msra.mxu0 %v1136_v2  ;;  %s1157_s26 = sld [smem:[#allocation6 + $0x2]]  ;;  %81 = vst [vmem:[#allocation2 + $0x20] sm:$0xff] %v76_v10  ;;  %v1178_v12 = vld [vmem:[#allocation10 + $0x48] sm:$0xff]  ;;  %v1184_v13 = vld [vmem:[#allocation10 + $0x40] sm:$0xff]  ;;  %v1188_v14 = vld [vmem:[#allocation10 + $0x38] sm:$0xff] }
  0x3b   :  { %751 = vmatprep.subr.mxu1 %v1059_v0  ;;  %821 = vmatprep.subr.mxu0 %v1059_v0  ;;  %s86_s27 = scalar_lea.vmem [#allocation2], %s1132_s2  ;;  %v1202_v22 = vld [vmem:[#allocation10 + $0x30] sm:$0xff]  ;;  %v1208_v25 = vld [vmem:[#allocation10 + $0x28] sm:$0xff]  ;;  %v1214_v26 = vld [vmem:[#allocation10 + $0x20] sm:$0xff]  ;;  %s651_s1 = sld [smem:[#allocation5 + $0x3]] }
  0x3c   :  { %752 = vmatpush3.msra.mxu1 %v1145_v3  ;;  %822 = vmatpush3.msra.mxu0 %v1145_v3  ;;  %s88_s28 = scalar_lea.vmem [#allocation2], %s1138_s5  ;;  %v1220_v27 = vld [vmem:[#allocation10 + $0x18] sm:$0xff]  ;;  %v1226_v28 = vld [vmem:[#allocation10 + $0x10] sm:$0xff]  ;;  %v1232_v29 = vld [vmem:[#allocation10 + $0x8] sm:$0xff]  ;;  %s652_s11 = sld [smem:[#allocation6 + $0x3]] }
  0x3d   :  { %753 = vmatprep.subr.mxu1 %v1059_v0  ;;  %823 = vmatprep.subr.mxu0 %v1059_v0  ;;  %s94_s29 = scalar_lea.vmem [#allocation2], %s1141_s23  ;;  %v1238_v30 = vld [vmem:[#allocation10] sm:$0xff]  ;;  %v82_v34 = vld [vmem:[%s1373_s4] sm:$0x1]  ;;  %s653_s4 = sld [smem:[#allocation5 + $0x4]]  ;;  %v514_v53 = vld [vmem:[#allocation12 + $0x78] sm:$0xff] }
  0x3e   :  { %754 = vmatpush3.msra.mxu1 %v1155_v4  ;;  %824 = vmatpush3.msra.mxu0 %v1155_v4  ;;  %s96_s30 = scalar_lea.vmem [#allocation2], %s1147_s24  ;;  %v83_v35 = vmul.f32 2.0, %v82_v34  ;;  %s654_s16 = sld [smem:[#allocation6 + $0x4]]  ;;  %v513_v55 = vld [vmem:[#allocation12 + $0x70] sm:$0xff]  ;;  %v512_v56 = vld [vmem:[#allocation12 + $0x68] sm:$0xff]  ;;  %v511_v57 = vld [vmem:[#allocation12 + $0x60] sm:$0xff] }
  0x3f   :  { %755 = vmatprep.subr.mxu1 %v1059_v0  ;;  %825 = vmatprep.subr.mxu0 %v1059_v0  ;;  %s102_s8 = scalar_lea.vmem [#allocation2], %s1151_s25  ;;  %v510_v58 = vld [vmem:[#allocation12 + $0x58] sm:$0xff]  ;;  %v509_v59 = vld [vmem:[#allocation12 + $0x50] sm:$0xff]  ;;  %v508_v60 = vld [vmem:[#allocation12 + $0x48] sm:$0xff]  ;;  %s655_s19 = sld [smem:[#allocation5 + $0x5]] }
  0x40   :  { %756 = vmatpush3.msra.mxu1 %v1161_v5  ;;  %826 = vmatpush3.msra.mxu0 %v1161_v5  ;;  %s104_s0 = scalar_lea.vmem [#allocation2], %s1157_s26  ;;  %v1286_v37 = vrot.slane %v83_v35, %v128_v36  ;;  %v507_v61 = vld [vmem:[#allocation12 + $0x40] sm:$0xff]  ;;  %v506_v62 = vld [vmem:[#allocation12 + $0x38] sm:$0xff]  ;;  %v505_v63 = vld [vmem:[#allocation12 + $0x30] sm:$0xff]  ;;  %s656_s20 = sld [smem:[#allocation6 + $0x5]] }
  0x41   :  { %757 = vmatprep.subr.mxu1 %v1059_v0  ;;  %827 = vmatprep.subr.mxu0 %v1059_v0  ;;  %v87_v15 = vld [vmem:[%s86_s27] sm:$0x1]  ;;  %s205_s14 = scalar_lea.vmem [#allocation2], %s651_s1  ;;  %v499_v7 = vld [vmem:[#allocation12] sm:$0xff] }
  0x42   :  { %758 = vmatpush3.msra.mxu1 %v1172_v11  ;;  %828 = vmatpush3.msra.mxu0 %v1172_v11  ;;  %v89_v16 = vld [vmem:[%s88_s28] sm:$0x1]  ;;  %s207_s15 = scalar_lea.vmem [#allocation2], %s652_s11 }
  0x43   :  { %759 = vmatprep.subr.mxu1 %v1059_v0  ;;  %829 = vmatprep.subr.mxu0 %v1059_v0  ;;  %v95_v17 = vld [vmem:[%s94_s29] sm:$0x1]  ;;  %v90_v18 = vadd.f32 %v89_v16, %v87_v15  ;;  %s302_s17 = scalar_lea.vmem [#allocation2], %s653_s4 }
  0x44   :  { %760 = vmatpush3.msra.mxu1 %v1178_v12  ;;  %830 = vmatpush3.msra.mxu0 %v1178_v12  ;;  %v97_v19 = vld [vmem:[%s96_s30] sm:$0x1]  ;;  %s304_s18 = scalar_lea.vmem [#allocation2], %s654_s16 }
  0x45   :  { %761 = vmatprep.subr.mxu1 %v1059_v0  ;;  %831 = vmatprep.subr.mxu0 %v1059_v0  ;;  %v103_v20 = vld [vmem:[%s102_s8] sm:$0x1]  ;;  %v98_v23 = vadd.f32 %v97_v19, %v95_v17  ;;  %91 = vst [vmem:[#allocation3] sm:$0x1] %v90_v18  ;;  %s399_s21 = scalar_lea.vmem [#allocation2], %s655_s19 }
  0x46   :  { %762 = vmatpush3.msra.mxu1 %v1184_v13  ;;  %v105_v21 = vld [vmem:[%s104_s0] sm:$0x1]  ;;  %832 = vmatpush3.msra.mxu0 %v1184_v13  ;;  %s401_s3 = scalar_lea.vmem [#allocation2], %s656_s20 }
  0x47   :  { %763 = vmatprep.subr.mxu1 %v1059_v0  ;;  %v106_v24 = vadd.f32 %v105_v21, %v103_v20  ;;  %833 = vmatprep.subr.mxu0 %v1059_v0  ;;  %99 = vst [vmem:[#allocation3 + $0x1] sm:$0x1] %v98_v23  ;;  %v657_v15 = vld [vmem:[%s1375_s6] ss:$0 sm:$0xff]  ;;  %s1061_s6 = smov [#allocation13]  }
  0x48   :  { %764 = vmatpush3.msra.mxu1 %v1188_v14  ;;  %834 = vmatpush3.msra.mxu0 %v1188_v14  ;;  %s622_s5 = sshll.u32 %s1061_s6, 4  ;;  %s623_s5 = int_to_ptr.vmem [resolvable:$true] %s622_s5 }
  0x49   :  { %765 = vmatprep.subr.mxu1 %v1059_v0  ;;  %107 = vst [vmem:[#allocation3 + $0x2] sm:$0x1] %v106_v24  ;;  %835 = vmatprep.subr.mxu0 %v1059_v0  ;;  %s1024_s23 = scalar_lea.vmem %s623_s5, 640  ;;  %p1029_p7 = scmp.lt.s32.totalorder %s623_s5, %s623_s5 }
  0x4a   :  { %766 = vmatpush3.msra.mxu1 %v1202_v22  ;;  %836 = vmatpush3.msra.mxu0 %v1202_v22  ;;  %p1025_p6 = scmp.ne.s32.totalorder %s623_s5, %s1024_s23  ;;  %p1030_p8 = scmp.lt.s32.totalorder %s1024_s23, %s1024_s23 }
  0x4b   :  { %767 = vmatprep.subr.mxu1 %v1059_v0  ;;  %837 = vmatprep.subr.mxu0 %v1059_v0 }
  0x4c   :  { %768 = vmatpush3.msra.mxu1 %v1208_v25  ;;  %838 = vmatpush3.msra.mxu0 %v1208_v25  ;;  %p1031_p9 = por %p1030_p8, %p1029_p7 }
  0x4d   :  { %769 = vmatprep.subr.mxu1 %v1059_v0  ;;  %839 = vmatprep.subr.mxu0 %v1059_v0 }
  0x4e   :  { %770 = vmatpush3.msra.mxu1 %v1214_v26  ;;  %840 = vmatpush3.msra.mxu0 %v1214_v26  ;;  %p1032_p10 = pnand %p1031_p9, %p1025_p6 }
  0x4f   :  { %771 = vmatprep.subr.mxu1 %v1059_v0  ;;  %841 = vmatprep.subr.mxu0 %v1059_v0 }
  0x50   :  { %772 = vmatpush3.msra.mxu1 %v1220_v27  ;;  %842 = vmatpush3.msra.mxu0 %v1220_v27  ;;  %v108_v31 = vld [vmem:[#allocation3] sm:$0xff] }
  0x51   :  { %773 = vmatprep.subr.mxu1 %v1059_v0  ;;  %843 = vmatprep.subr.mxu0 %v1059_v0 }
  0x52   :  { %774 = vmatpush3.msra.mxu1 %v1226_v28  ;;  %844 = vmatpush3.msra.mxu0 %v1226_v28 }
  0x53   :  { %775 = vmatprep.subr.mxu1 %v1059_v0  ;;  %845 = vmatprep.subr.mxu0 %v1059_v0 }
  0x54   :  { %776 = vmatpush3.msra.mxu1 %v1232_v29  ;;  %846 = vmatpush3.msra.mxu0 %v1232_v29 }
  0x55   :  { %777 = vmatprep.subr.mxu1 %v1059_v0  ;;  %847 = vmatprep.subr.mxu0 %v1059_v0 }
  0x56   :  { %778 = vmatpush3.msra.mxu1 %v1238_v30  ;;  %848 = vmatpush3.msra.mxu0 %v1238_v30 }
  0x57   :  { %780 = vmatmul.mubr.f32.vlgmr.msra.gmra.mxu1 %v108_v31  ;;  %782 = vmatprep.subr.mxu1 %v1059_v0 }
  0x58   :  { %783 = vmatpush3.msra.mxu1 %v1134_v1  ;;  %814 = vmatprep.mubr.msk.f32.mxu1 %vm1060_vm0, %v1059_v0 }
  0x59   :  { %784 = vmatprep.subr.mxu1 %v1059_v0  ;;  %887 = vmatprep.subr.mxu0 %v1059_v0 }
  0x5a   :  { %785 = vmatpush3.msra.mxu1 %v1136_v2 }
  0x5b   :  { %786 = vmatprep.subr.mxu1 %v1059_v0 }
  0x5c   :  { %787 = vmatpush3.msra.mxu1 %v1145_v3 }
  0x5d   :  { %788 = vmatprep.subr.mxu1 %v1059_v0 }
  0x5e   :  { %789 = vmatpush3.msra.mxu1 %v1155_v4 }
  0x5f   :  { %790 = vmatprep.subr.mxu1 %v1059_v0 }
  0x60   :  { %791 = vmatpush3.msra.mxu1 %v1161_v5 }
  0x61   :  { %792 = vmatprep.subr.mxu1 %v1059_v0 }
  0x62   :  { %793 = vmatpush3.msra.mxu1 %v1172_v11 }
  0x63   :  { %794 = vmatprep.subr.mxu1 %v1059_v0 }
  0x64   :  { %795 = vmatpush3.msra.mxu1 %v1178_v12 }
  0x65   :  { %796 = vmatprep.subr.mxu1 %v1059_v0 }
  0x66   :  { %797 = vmatpush3.msra.mxu1 %v1184_v13 }
  0x67   :  { %798 = vmatprep.subr.mxu1 %v1059_v0 }
  0x68   :  { %799 = vmatpush3.msra.mxu1 %v1188_v14 }
  0x69   :  { %800 = vmatprep.subr.mxu1 %v1059_v0 }
  0x6a   :  { %801 = vmatpush3.msra.mxu1 %v1202_v22 }
  0x6b   :  { %802 = vmatprep.subr.mxu1 %v1059_v0 }
  0x6c   :  { %803 = vmatpush3.msra.mxu1 %v1208_v25 }
  0x6d   :  { %804 = vmatprep.subr.mxu1 %v1059_v0 }
  0x6e   :  { %805 = vmatpush3.msra.mxu1 %v1214_v26 }
  0x6f   :  { %806 = vmatprep.subr.mxu1 %v1059_v0 }
  0x70   :  { %807 = vmatpush3.msra.mxu1 %v1220_v27 }
  0x71   :  { %808 = vmatprep.subr.mxu1 %v1059_v0 }
  0x72   :  { %809 = vmatpush3.msra.mxu1 %v1226_v28 }
  0x73   :  { %810 = vmatprep.subr.mxu1 %v1059_v0 }
  0x74   :  { %811 = vmatpush3.msra.mxu1 %v1232_v29 }
  0x75   :  { %812 = vmatprep.subr.mxu1 %v1059_v0 }
  0x76   :  { %813 = vmatpush3.msra.mxu1 %v1238_v30 }
  0x77   :  { %852 = vmatprep.subr.mxu1 %v1059_v0 }
 0x117   :  { %v197_v38 = vpop.f32.mrf.mxu1 }
 0x118   :  { %v1289_v39 = vadd.f32 %v197_v38, %v1286_v37 }
 0x119   :  { %v781_v40 = vpop.f32.mrf.mxu1 }
 0x11a   :  { %v201_v41 = vmax.f32 %v1289_v39, 0.0 }
 0x11c   :  { %202 = vst [vmem:[#allocation2 + $0x8] sm:$0xff] %v201_v41 }
 0x123   :  { %v206_v42 = vld [vmem:[%s205_s14] sm:$0x1] }
 0x124   :  { %v208_v43 = vld [vmem:[%s207_s15] sm:$0x1] }
 0x125   :  { %v209_v44 = vadd.f32 %v208_v43, %v206_v42 }
 0x127   :  { %210 = vst [vmem:[#allocation3] sm:$0x1] %v209_v44 }
 0x12e   :  { %v211_v45 = vld [vmem:[#allocation3] sm:$0xff] }
 0x12f   :  { %815 = vmatmul.mubr.f32.vlgmr.msra.gmra.mxu1 %v211_v45 }
 0x130   :  { %853 = vmatpush3.msra.mxu1 %v1134_v1  ;;  %884 = vmatprep.mubr.msk.f32.mxu1 %vm1060_vm0, %v1059_v0  ;;  %v504_v1 = vld [vmem:[#allocation12 + $0x28] sm:$0xff] }
 0x131   :  { %854 = vmatprep.subr.mxu1 %v1059_v0 }
 0x132   :  { %855 = vmatpush3.msra.mxu1 %v1136_v2  ;;  %v503_v2 = vld [vmem:[#allocation12 + $0x20] sm:$0xff] }
 0x133   :  { %856 = vmatprep.subr.mxu1 %v1059_v0 }
 0x134   :  { %857 = vmatpush3.msra.mxu1 %v1145_v3  ;;  %v502_v3 = vld [vmem:[#allocation12 + $0x18] sm:$0xff] }
 0x135   :  { %858 = vmatprep.subr.mxu1 %v1059_v0 }
 0x136   :  { %859 = vmatpush3.msra.mxu1 %v1155_v4  ;;  %v501_v4 = vld [vmem:[#allocation12 + $0x10] sm:$0xff] }
 0x137   :  { %860 = vmatprep.subr.mxu1 %v1059_v0 }
 0x138   :  { %861 = vmatpush3.msra.mxu1 %v1161_v5  ;;  %v500_v5 = vld [vmem:[#allocation12 + $0x8] sm:$0xff] }
 0x139   :  { %862 = vmatprep.subr.mxu1 %v1059_v0 }
 0x13a   :  { %863 = vmatpush3.msra.mxu1 %v1172_v11 }
 0x13b   :  { %864 = vmatprep.subr.mxu1 %v1059_v0 }
 0x13c   :  { %865 = vmatpush3.msra.mxu1 %v1178_v12 }
 0x13d   :  { %866 = vmatprep.subr.mxu1 %v1059_v0 }
 0x13e   :  { %867 = vmatpush3.msra.mxu1 %v1184_v13 }
 0x13f   :  { %868 = vmatprep.subr.mxu1 %v1059_v0 }
 0x140   :  { %869 = vmatpush3.msra.mxu1 %v1188_v14 }
 0x141   :  { %870 = vmatprep.subr.mxu1 %v1059_v0 }
 0x142   :  { %871 = vmatpush3.msra.mxu1 %v1202_v22 }
 0x143   :  { %872 = vmatprep.subr.mxu1 %v1059_v0 }
 0x144   :  { %873 = vmatpush3.msra.mxu1 %v1208_v25 }
 0x145   :  { %874 = vmatprep.subr.mxu1 %v1059_v0 }
 0x146   :  { %875 = vmatpush3.msra.mxu1 %v1214_v26 }
 0x147   :  { %876 = vmatprep.subr.mxu1 %v1059_v0 }
 0x148   :  { %877 = vmatpush3.msra.mxu1 %v1220_v27 }
 0x149   :  { %878 = vmatprep.subr.mxu1 %v1059_v0 }
 0x14a   :  { %879 = vmatpush3.msra.mxu1 %v1226_v28 }
 0x14b   :  { %880 = vmatprep.subr.mxu1 %v1059_v0 }
 0x14c   :  { %881 = vmatpush3.msra.mxu1 %v1232_v29 }
 0x14d   :  { %882 = vmatprep.subr.mxu1 %v1059_v0 }
 0x14e   :  { %883 = vmatpush3.msra.mxu1 %v1238_v30 }
 0x1ef   :  { %v294_v46 = vpop.f32.mrf.mxu1 }
 0x1f0   :  { %v1328_v47 = vadd.f32 %v294_v46, %v1286_v37 }
 0x1f1   :  { %v816_v48 = vpop.f32.mrf.mxu1 }
 0x1f2   :  { %v298_v49 = vmax.f32 %v1328_v47, 0.0 }
 0x1f4   :  { %299 = vst [vmem:[#allocation2 + $0x10] sm:$0xff] %v298_v49 }
 0x1fb   :  { %v303_v50 = vld [vmem:[%s302_s17] sm:$0x1] }
 0x1fc   :  { %v305_v51 = vld [vmem:[%s304_s18] sm:$0x1] }
 0x1fd   :  { %v306_v52 = vadd.f32 %v305_v51, %v303_v50 }
 0x1ff   :  { %307 = vst [vmem:[#allocation3] sm:$0x1] %v306_v52 }
 0x206   :  { %v308_v54 = vld [vmem:[#allocation3] sm:$0xff] }
 0x207   :  { %850 = vmatmul.mubr.f32.vlgmr.msra.gmra.mxu0 %v308_v54 }
 0x208   :  { %888 = vmatpush3.msra.mxu0 %v514_v53  ;;  %919 = vmatprep.mubr.msk.f32.mxu0 %vm1060_vm0, %v1059_v0 }
 0x209   :  { %889 = vmatprep.subr.mxu0 %v1059_v0 }
 0x20a   :  { %890 = vmatpush3.msra.mxu0 %v513_v55 }
 0x20b   :  { %891 = vmatprep.subr.mxu0 %v1059_v0 }
 0x20c   :  { %892 = vmatpush3.msra.mxu0 %v512_v56 }
 0x20d   :  { %893 = vmatprep.subr.mxu0 %v1059_v0 }
 0x20e   :  { %894 = vmatpush3.msra.mxu0 %v511_v57 }
 0x20f   :  { %895 = vmatprep.subr.mxu0 %v1059_v0 }
 0x210   :  { %896 = vmatpush3.msra.mxu0 %v510_v58 }
 0x211   :  { %897 = vmatprep.subr.mxu0 %v1059_v0 }
 0x212   :  { %898 = vmatpush3.msra.mxu0 %v509_v59 }
 0x213   :  { %899 = vmatprep.subr.mxu0 %v1059_v0 }
 0x214   :  { %900 = vmatpush3.msra.mxu0 %v508_v60 }
 0x215   :  { %901 = vmatprep.subr.mxu0 %v1059_v0 }
 0x216   :  { %902 = vmatpush3.msra.mxu0 %v507_v61 }
 0x217   :  { %903 = vmatprep.subr.mxu0 %v1059_v0 }
 0x218   :  { %904 = vmatpush3.msra.mxu0 %v506_v62 }
 0x219   :  { %905 = vmatprep.subr.mxu0 %v1059_v0 }
 0x21a   :  { %906 = vmatpush3.msra.mxu0 %v505_v63 }
 0x21b   :  { %907 = vmatprep.subr.mxu0 %v1059_v0 }
 0x21c   :  { %908 = vmatpush3.msra.mxu0 %v504_v1 }
 0x21d   :  { %909 = vmatprep.subr.mxu0 %v1059_v0 }
 0x21e   :  { %910 = vmatpush3.msra.mxu0 %v503_v2 }
 0x21f   :  { %911 = vmatprep.subr.mxu0 %v1059_v0 }
 0x220   :  { %912 = vmatpush3.msra.mxu0 %v502_v3 }
 0x221   :  { %913 = vmatprep.subr.mxu0 %v1059_v0 }
 0x222   :  { %914 = vmatpush3.msra.mxu0 %v501_v4 }
 0x223   :  { %915 = vmatprep.subr.mxu0 %v1059_v0 }
 0x224   :  { %916 = vmatpush3.msra.mxu0 %v500_v5 }
 0x225   :  { %917 = vmatprep.subr.mxu0 %v1059_v0 }
 0x226   :  { %918 = vmatpush3.msra.mxu0 %v499_v7 }
 0x227   :  { %920 = vmatmul.mubr.f32.vlgmr.msra.gmra.mxu0 %v1163_v6 }
 0x228   :  { %922 = vmatprep.mubr.msk.f32.mxu0 %vm1060_vm0, %v1059_v0 }
 0x22b   :  { %923 = vmatmul.mubr.f32.gmra.mxu0 %v201_v41 }
 0x22c   :  { %925 = vmatprep.mubr.msk.f32.mxu0 %vm1060_vm0, %v1059_v0 }
 0x22f   :  { %926 = vmatmul.mubr.f32.gmra.mxu0 %v298_v49 }
 0x230   :  { %928 = vmatprep.mubr.msk.f32.mxu0 %vm1060_vm0, %v1059_v0 }
 0x2c7   :  { %v391_v8 = vpop.f32.mrf.mxu0 }
 0x2c8   :  { %v392_v9 = vadd.f32 %v391_v8, %v1286_v37 }
 0x2c9   :  { %v851_v10 = vpop.f32.mrf.mxu0 }
 0x2ca   :  { %v395_v6 = vmax.f32 %v392_v9, 0.0 }
 0x2cc   :  { %396 = vst [vmem:[#allocation2 + $0x18] sm:$0xff] %v395_v6  ;;  %929 = vmatmul.mubr.f32.gmra.mxu0 %v395_v6 }
 0x2cd   :  { %931 = vmatprep.mubr.msk.f32.mxu0 %vm1060_vm0, %v1059_v0 }
 0x2d3   :  { %v400_v11 = vld [vmem:[%s399_s21] sm:$0x1] }
 0x2d4   :  { %v402_v12 = vld [vmem:[%s401_s3] sm:$0x1] }
 0x2d5   :  { %v403_v13 = vadd.f32 %v402_v12, %v400_v11 }
 0x2d7   :  { %404 = vst [vmem:[#allocation3] sm:$0x1] %v403_v13 }
 0x2de   :  { %v405_v14 = vld [vmem:[#allocation3] sm:$0xff] }
 0x2df   :  { %885 = vmatmul.mubr.f32.vlgmr.msra.gmra.mxu1 %v405_v14 }
 0x2e7   :  { %v588_v16 = vpop.f32.mrf.mxu0 }
 0x2e8   :  { %v589_v17 = vadd.f32 %v657_v15, %v588_v16 }
 0x2e9   :  { %v921_v18 = vpop.f32.mrf.mxu0 }
 0x2ea   :  { %612 = vst [vmem:[#allocation13] sm:$0xff] %v589_v17 }
 0x2eb   :  { %v593_v19 = vpop.f32.mrf.mxu0 }
 0x2ec   :  { %v594_v20 = vadd.f32 %v657_v15, %v593_v19 }
 0x2ed   :  { %v924_v21 = vpop.f32.mrf.mxu0 }
 0x2ee   :  { %613 = vst [vmem:[#allocation13 + $0x8] sm:$0xff] %v594_v20 }
 0x2ef   :  { %v598_v0 = vpop.f32.mrf.mxu0 }
 0x2f0   :  { %v599_v22 = vadd.f32 %v657_v15, %v598_v0 }
 0x2f1   :  { %v927_v23 = vpop.f32.mrf.mxu0 }
 0x2f2   :  { %614 = vst [vmem:[#allocation13 + $0x10] sm:$0xff] %v599_v22 }
 0x38c   :  { %v603_v24 = vpop.f32.mrf.mxu0 }
 0x38d   :  { %v604_v25 = vadd.f32 %v657_v15, %v603_v24 }
 0x38e   :  { %v930_v26 = vpop.f32.mrf.mxu0 }
 0x38f   :  { %615 = vst [vmem:[#allocation13 + $0x18] sm:$0xff] %v604_v25 }
 0x39f   :  { %v488_v27 = vpop.f32.mrf.mxu1 }
 0x3a0   :  { %v489_v28 = vadd.f32 %v488_v27, %v1286_v37 }
 0x3a1   :  { %v886_v29 = vpop.f32.mrf.mxu1 }
 0x3a2   :  { %v492_v30 = vmax.f32 %v489_v28, 0.0 }
 0x3a4   :  { %493 = vst [vmem:[#allocation2 + $0x20] sm:$0xff] %v492_v30  ;;  %932 = vmatmul.mubr.f32.gmra.mxu0 %v492_v30 }
 0x464   :  { %v608_v31 = vpop.f32.mrf.mxu0 }
 0x465   :  { %v609_v32 = vadd.f32 %v657_v15, %v608_v31 }
 0x466   :  { %v933_v33 = vpop.f32.mrf.mxu0 }
 0x467   :  { %616 = vst [vmem:[#allocation13 + $0x20] sm:$0xff] %v609_v32 }
 0x468   :  { %1035 = shalt.err (!%p1032_p10)
}
 0x469   :  { %628 = dma.vmem_to_hbm [thread:$0]  %s623_s5, 640, %s1376_s7, [#allocation9], %s1056_s12, %s1056_s12, %s1057_s13  }
 0x46a   :  { %1050 = dma.done.wait [#allocation9], 640  }
 0x46b   :  { %1051 = vsyncadd [#allocation9], 4294966656 }
 0x46c   :  { %632 = vsyncpa [#allocation8], 1 }
 0x46d   :  { %633 = vsyncpa [#allocation11], 1 }
 0x46e   :  { %634 = vsyncpa [#allocation9], 1 }

</bundles_post_ra>
